<compile_context>
chip_gen: v7x
topology: tpu7x:2x2x1
jax: 0.10.0
libtpu: 0.0.40
codegen_flags: <defaults>
</compile_context>

<pallas_src>
import functools

import jax
import jax.numpy as jnp
from jax.experimental import pallas as pl
from jax.experimental.pallas import tpu as pltpu


def _round_up(n, m):
    return ((n + m - 1) // m) * m


def _choose_tile_b(batch, requested):
    """Batch tile: multiple of 8, <= requested, and (when the batch allows)
    capped so the grid has at least 2 steps (pipeline overlap / 2 v7x TCs)."""
    tb = max(8, _round_up(min(requested, batch), 8))
    if batch >= 16:
        half = max(8, _round_up((batch + 1) // 2, 8))
        tb = min(tb, half)
    return tb


def mlp_kernel(x_ref, w1_ref, b1_ref, w2_ref, b2_ref, w3_ref, b3_ref, o_ref,
               *, num_classes):
    # Layer 1: x arrives f32 (streamed operand, no wrapper cast pass); cast to
    # bf16 only at the MXU input. f32 accumulation via preferred_element_type.
    x_bf16 = x_ref[...].astype(jnp.bfloat16)
    h1 = jnp.dot(x_bf16, w1_ref[...], preferred_element_type=jnp.float32)
    h1 = jnp.maximum(h1 + b1_ref[...], 0.0)

    # Layer 2: cast activations to bf16 only for the MXU; elementwise stays f32.
    h2 = jnp.dot(h1.astype(jnp.bfloat16), w2_ref[...],
                 preferred_element_type=jnp.float32)
    h2 = jnp.maximum(h2 + b2_ref[...], 0.0)

    # Layer 3.
    h3 = jnp.dot(h2.astype(jnp.bfloat16), w3_ref[...],
                 preferred_element_type=jnp.float32)
    h3 = jnp.maximum(h3 + b3_ref[...], 0.0)

    # Mask padded class lanes so they contribute nothing to the softmax.
    # (Applied before the row-max; valid logits are >= 0 after the ReLU, so the
    # masked lanes' exp underflows cleanly to 0.)
    lane = jax.lax.broadcasted_iota(jnp.int32, h3.shape, dimension=1)
    h3 = jnp.where(lane < num_classes, h3, -1e30)

    # Softmax over the (padded, lane-dense) class dimension, f32 math.
    m = jnp.max(h3, axis=-1, keepdims=True)
    e = jnp.exp(h3 - m)
    denom = jnp.sum(e, axis=-1, keepdims=True)
    o_ref[...] = (e * pl.reciprocal(denom, approx=True)).astype(o_ref.dtype)


def mlp_forward(x, params, *, tile_b=1024):
    """x: (B, input_dim) float32. params: dict of w1,b1,w2,b2,w3,b3 (f32).

    Returns softmax probabilities in the PADDED layout (Bp, Cp) as bfloat16;
    only [:B, :num_classes] is meaningful. Returning the padded slab avoids a
    standalone post-kernel slice that would re-read the whole output from HBM —
    consumers should accept this layout or fuse the slice downstream.
    """
    B, D_in = x.shape
    H1 = params["w1"].shape[1]
    H2 = params["w2"].shape[1]
    C = params["w3"].shape[1]

    # Pad only matmul-N / store dims to lane width (128). D_in is left as-is:
    # a full-extent block is legal and it keeps x's HBM bytes minimal.
    H1p = _round_up(H1, 128)
    H2p = _round_up(H2, 128)
    Cp = _round_up(C, 128)

    tile_b = _choose_tile_b(B, tile_b)
    Bp = _round_up(B, tile_b)
    grid = (Bp // tile_b,)

    # x goes straight to the kernel in f32; only a batch pad if B % tile_b != 0.
    x_p = x if Bp == B else jnp.pad(x, ((0, Bp - B), (0, 0)))

    # Weights/biases are tiny (< 0.5 MiB total); pad + cast once. bf16 weights
    # feed the MXU; f32 biases feed the VPU add.
    w1_p = jnp.pad(params["w1"], ((0, 0), (0, H1p - H1))).astype(jnp.bfloat16)
    b1_p = jnp.pad(params["b1"], ((0, 0), (0, H1p - H1))).astype(jnp.float32)
    w2_p = jnp.pad(params["w2"], ((0, H1p - H1), (0, H2p - H2))).astype(jnp.bfloat16)
    b2_p = jnp.pad(params["b2"], ((0, 0), (0, H2p - H2))).astype(jnp.float32)
    w3_p = jnp.pad(params["w3"], ((0, H2p - H2), (0, Cp - C))).astype(jnp.bfloat16)
    b3_p = jnp.pad(params["b3"], ((0, 0), (0, Cp - C))).astype(jnp.float32)

    # Whole weights/biases resident in VMEM with a constant index map
    # (fetched once across the grid).
    full = lambda shape: pl.BlockSpec(shape, lambda i: (0, 0))

    out_padded = pl.pallas_call(
        functools.partial(mlp_kernel, num_classes=C),
        out_shape=jax.ShapeDtypeStruct((Bp, Cp), jnp.bfloat16),
        grid_spec=pltpu.PrefetchScalarGridSpec(
            num_scalar_prefetch=0,
            grid=grid,
            in_specs=[
                pl.BlockSpec((tile_b, D_in), lambda i: (i, 0)),  # x tile (streamed, f32)
                full((D_in, H1p)), full((1, H1p)),               # fc_1
                full((H1p, H2p)), full((1, H2p)),                # fc_2
                full((H2p, Cp)), full((1, Cp)),                  # fc_3
            ],
            out_specs=pl.BlockSpec((tile_b, Cp), lambda i: (i, 0)),
        ),
        compiler_params=pltpu.CompilerParams(
            dimension_semantics=("parallel",),
        ),
    )(x_p, w1_p, b1_p, w2_p, b2_p, w3_p, b3_p)

    return out_padded


def init_params(key, input_dim=784, num_classes=10):
    """Deterministic init matching the module's layer shapes (weights stored (in, out))."""
    k1, k2, k3, k4, k5, k6 = jax.random.split(key, 6)

    def linear(kw, kb, fan_in, fan_out):
        # PyTorch-style uniform(-1/sqrt(fan_in), 1/sqrt(fan_in))
        bound = 1.0 / jnp.sqrt(fan_in)
        w = jax.random.uniform(kw, (fan_in, fan_out), jnp.float32, -bound, bound)
        b = jax.random.uniform(kb, (1, fan_out), jnp.float32, -bound, bound)
        return w, b

    w1, b1 = linear(k1, k2, input_dim, 128)
    w2, b2 = linear(k3, k4, 128, 64)
    w3, b3 = linear(k5, k6, 64, num_classes)
    return {"w1": w1, "b1": b1, "w2": w2, "b2": b2, "w3": w3, "b3": b3}


def ref_forward(x, params):
    """Pure-JAX f32 reference matching the PyTorch forward."""
    h = jax.nn.relu(x @ params["w1"] + params["b1"])
    h = jax.nn.relu(h @ params["w2"] + params["b2"])
    h = jax.nn.relu(h @ params["w3"] + params["b3"])
    return jax.nn.softmax(h, axis=-1)


if __name__ == "__main__":
    key = jax.random.PRNGKey(0)
    k_params, k_x = jax.random.split(key)

    input_dim = 784
    num_classes = 10
    batch = 128  # small test batch -> tile_b clamps to 64, grid of 2 steps

    params = init_params(k_params, input_dim, num_classes)
    x = jax.random.normal(k_x, (batch, input_dim), jnp.float32)

    out_padded = jax.block_until_ready(mlp_forward(x, params))

    # Slice padding off only for the correctness check (real consumers should
    # accept / fuse the padded layout).
    out = out_padded[:batch, :num_classes].astype(jnp.float32)

    # Correctness checks vs. pure-JAX f32 reference
    # (bf16 matmuls + bf16 output + approx reciprocal -> relaxed tolerances).
    ref = ref_forward(x, params)
    assert out.shape == (batch, num_classes)
    row_sums = jnp.sum(out, axis=-1)
    assert bool(jnp.all(jnp.abs(row_sums - 1.0) < 1e-2))
    assert bool(jnp.max(jnp.abs(out - ref)) < 4e-2)

    print("KERNEL_OK")
</pallas_src>

<mosaic_0001>
module attributes {stable_mosaic.version = 11 : i64} {
  func.func @mlp_kernel(%arg0: i32, %arg1: memref<64x784xf32, #tpu.memory_space<vmem>>, %arg2: memref<784x128xbf16, #tpu.memory_space<vmem>>, %arg3: memref<1x128xf32, #tpu.memory_space<vmem>>, %arg4: memref<128x128xbf16, #tpu.memory_space<vmem>>, %arg5: memref<1x128xf32, #tpu.memory_space<vmem>>, %arg6: memref<128x128xbf16, #tpu.memory_space<vmem>>, %arg7: memref<1x128xf32, #tpu.memory_space<vmem>>, %arg8: memref<64x128xbf16, #tpu.memory_space<vmem>>) attributes {dimension_semantics = [#tpu.dimension_semantics<parallel>], iteration_bounds = array<i64: 2>, scalar_prefetch = 0 : i64, scratch_operands = 0 : i64, tpu.core_type = #tpu.core_type<tc>, window_params = [{transform_indices = @transform_0, window_bounds = array<i64: 64, 784>}, {pipeline_mode = #tpu.pipeline_mode<synchronous>, transform_indices = @transform_1, window_bounds = array<i64: 784, 128>}, {pipeline_mode = #tpu.pipeline_mode<synchronous>, transform_indices = @transform_2, window_bounds = array<i64: 1, 128>}, {pipeline_mode = #tpu.pipeline_mode<synchronous>, transform_indices = @transform_3, window_bounds = array<i64: 128, 128>}, {pipeline_mode = #tpu.pipeline_mode<synchronous>, transform_indices = @transform_4, window_bounds = array<i64: 1, 128>}, {pipeline_mode = #tpu.pipeline_mode<synchronous>, transform_indices = @transform_5, window_bounds = array<i64: 128, 128>}, {pipeline_mode = #tpu.pipeline_mode<synchronous>, transform_indices = @transform_6, window_bounds = array<i64: 1, 128>}, {transform_indices = @transform_7, window_bounds = array<i64: 64, 128>}]} {
    %c0 = arith.constant 0 : index
    %c0_0 = arith.constant 0 : index
    %0 = vector.load %arg1[%c0, %c0_0] : memref<64x784xf32, #tpu.memory_space<vmem>>, vector<64x784xf32>
    %1 = arith.truncf %0 : vector<64x784xf32> to vector<64x784xbf16>
    %c0_1 = arith.constant 0 : index
    %c0_2 = arith.constant 0 : index
    %2 = vector.load %arg2[%c0_1, %c0_2] : memref<784x128xbf16, #tpu.memory_space<vmem>>, vector<784x128xbf16>
    %cst = arith.constant dense<0.000000e+00> : vector<64x128xf32>
    %3 = tpu.matmul %1, %2, %cst {dimension_numbers = #tpu.dot_dimension_numbers<[1], [0], [0], [1], [0, 0, 1, 1], [], []>} : vector<64x784xbf16>, vector<784x128xbf16>, vector<64x128xf32> -> vector<64x128xf32>
    %c0_3 = arith.constant 0 : index
    %c0_4 = arith.constant 0 : index
    %4 = vector.load %arg3[%c0_3, %c0_4] : memref<1x128xf32, #tpu.memory_space<vmem>>, vector<1x128xf32>
    %5 = vector.broadcast %4 : vector<1x128xf32> to vector<64x128xf32>
    %6 = arith.addf %3, %5 : vector<64x128xf32>
    %cst_5 = arith.constant 0.000000e+00 : f32
    %7 = vector.broadcast %cst_5 : f32 to vector<64x128xf32>
    %8 = arith.maximumf %6, %7 : vector<64x128xf32>
    %9 = arith.truncf %8 : vector<64x128xf32> to vector<64x128xbf16>
    %c0_6 = arith.constant 0 : index
    %c0_7 = arith.constant 0 : index
    %10 = vector.load %arg4[%c0_6, %c0_7] : memref<128x128xbf16, #tpu.memory_space<vmem>>, vector<128x128xbf16>
    %cst_8 = arith.constant dense<0.000000e+00> : vector<64x128xf32>
    %11 = tpu.matmul %9, %10, %cst_8 {dimension_numbers = #tpu.dot_dimension_numbers<[1], [0], [0], [1], [0, 0, 1, 1], [], []>} : vector<64x128xbf16>, vector<128x128xbf16>, vector<64x128xf32> -> vector<64x128xf32>
    %c0_9 = arith.constant 0 : index
    %c0_10 = arith.constant 0 : index
    %12 = vector.load %arg5[%c0_9, %c0_10] : memref<1x128xf32, #tpu.memory_space<vmem>>, vector<1x128xf32>
    %13 = vector.broadcast %12 : vector<1x128xf32> to vector<64x128xf32>
    %14 = arith.addf %11, %13 : vector<64x128xf32>
    %cst_11 = arith.constant 0.000000e+00 : f32
    %15 = vector.broadcast %cst_11 : f32 to vector<64x128xf32>
    %16 = arith.maximumf %14, %15 : vector<64x128xf32>
    %17 = arith.truncf %16 : vector<64x128xf32> to vector<64x128xbf16>
    %c0_12 = arith.constant 0 : index
    %c0_13 = arith.constant 0 : index
    %18 = vector.load %arg6[%c0_12, %c0_13] : memref<128x128xbf16, #tpu.memory_space<vmem>>, vector<128x128xbf16>
    %cst_14 = arith.constant dense<0.000000e+00> : vector<64x128xf32>
    %19 = tpu.matmul %17, %18, %cst_14 {dimension_numbers = #tpu.dot_dimension_numbers<[1], [0], [0], [1], [0, 0, 1, 1], [], []>} : vector<64x128xbf16>, vector<128x128xbf16>, vector<64x128xf32> -> vector<64x128xf32>
    %c0_15 = arith.constant 0 : index
    %c0_16 = arith.constant 0 : index
    %20 = vector.load %arg7[%c0_15, %c0_16] : memref<1x128xf32, #tpu.memory_space<vmem>>, vector<1x128xf32>
    %21 = vector.broadcast %20 : vector<1x128xf32> to vector<64x128xf32>
    %22 = arith.addf %19, %21 : vector<64x128xf32>
    %cst_17 = arith.constant 0.000000e+00 : f32
    %23 = vector.broadcast %cst_17 : f32 to vector<64x128xf32>
    %24 = arith.maximumf %22, %23 : vector<64x128xf32>
    %25 = tpu.iota {dimensions = array<i32: 1>} : vector<64x128xi32>
    %c10_i32 = arith.constant 10 : i32
    %26 = vector.broadcast %c10_i32 : i32 to vector<64x128xi32>
    %27 = arith.cmpi slt, %25, %26 : vector<64x128xi32>
    %cst_18 = arith.constant -1.000000e+30 : f32
    %28 = vector.broadcast %cst_18 : f32 to vector<64x128xf32>
    %29 = arith.select %27, %24, %28 : vector<64x128xi1>, vector<64x128xf32>
    %cst_19 = arith.constant dense<0xFF800000> : vector<64xf32>
    %30 = vector.multi_reduction <maximumf>, %29, %cst_19 [1] : vector<64x128xf32> to vector<64xf32>
    %31 = vector.shape_cast %30 : vector<64xf32> to vector<64x1xf32>
    %32 = vector.broadcast %31 : vector<64x1xf32> to vector<64x128xf32>
    %33 = arith.subf %29, %32 : vector<64x128xf32>
    %34 = math.exp %33 : vector<64x128xf32>
    %cst_20 = arith.constant dense<0.000000e+00> : vector<64xf32>
    %35 = vector.multi_reduction <add>, %34, %cst_20 [1] : vector<64x128xf32> to vector<64xf32>
    %36 = vector.shape_cast %35 : vector<64xf32> to vector<64x1xf32>
    %37 = tpu.reciprocal %36 {approx = true} : vector<64x1xf32> -> vector<64x1xf32>
    %38 = vector.broadcast %37 : vector<64x1xf32> to vector<64x128xf32>
    %39 = arith.mulf %34, %38 : vector<64x128xf32>
    %40 = arith.truncf %39 : vector<64x128xf32> to vector<64x128xbf16>
    %c0_21 = arith.constant 0 : index
    %c0_22 = arith.constant 0 : index
    %41 = vector.load %arg8[%c0_21, %c0_22] : memref<64x128xbf16, #tpu.memory_space<vmem>>, vector<64x128xbf16>
    tpu.vector_store %arg8[%c0_21, %c0_22], %40 {strides = array<i32>} : memref<64x128xbf16, #tpu.memory_space<vmem>>, vector<64x128xbf16>,
    return
  }
  func.func @transform_0(%arg0: i32) -> (i32, i32) {
    %c0_i32 = arith.constant 0 : i32
    %c0_i32_0 = arith.constant 0 : i32
    return %arg0, %c0_i32 : i32, i32
  }
  func.func @transform_1(%arg0: i32) -> (i32, i32) {
    %c0_i32 = arith.constant 0 : i32
    %c0_i32_0 = arith.constant 0 : i32
    %c0_i32_1 = arith.constant 0 : i32
    return %c0_i32, %c0_i32_0 : i32, i32
  }
  func.func @transform_2(%arg0: i32) -> (i32, i32) {
    %c0_i32 = arith.constant 0 : i32
    %c0_i32_0 = arith.constant 0 : i32
    %c0_i32_1 = arith.constant 0 : i32
    return %c0_i32, %c0_i32_0 : i32, i32
  }
  func.func @transform_3(%arg0: i32) -> (i32, i32) {
    %c0_i32 = arith.constant 0 : i32
    %c0_i32_0 = arith.constant 0 : i32
    %c0_i32_1 = arith.constant 0 : i32
    return %c0_i32, %c0_i32_0 : i32, i32
  }
  func.func @transform_4(%arg0: i32) -> (i32, i32) {
    %c0_i32 = arith.constant 0 : i32
    %c0_i32_0 = arith.constant 0 : i32
    %c0_i32_1 = arith.constant 0 : i32
    return %c0_i32, %c0_i32_0 : i32, i32
  }
  func.func @transform_5(%arg0: i32) -> (i32, i32) {
    %c0_i32 = arith.constant 0 : i32
    %c0_i32_0 = arith.constant 0 : i32
    %c0_i32_1 = arith.constant 0 : i32
    return %c0_i32, %c0_i32_0 : i32, i32
  }
  func.func @transform_6(%arg0: i32) -> (i32, i32) {
    %c0_i32 = arith.constant 0 : i32
    %c0_i32_0 = arith.constant 0 : i32
    %c0_i32_1 = arith.constant 0 : i32
    return %c0_i32, %c0_i32_0 : i32, i32
  }
  func.func @transform_7(%arg0: i32) -> (i32, i32) {
    %c0_i32 = arith.constant 0 : i32
    %c0_i32_0 = arith.constant 0 : i32
    return %arg0, %c0_i32 : i32, i32
  }
}

</mosaic_0001>

<bundles_post_ra>
// kernel: tpu_custom_call.1
= control target key start
LH: loop header
LB: loop body
LE: loop exit
PB: predicated region body
PF: predicated region fallthrough
CT: control target
= control target key end

     0   :  { %12 = vsyncpa [#allocation3], 0  ;;  %s2500_s0 = inlined_call_operand.vmem [shape: f32[128,784], index: 0, kind: input, shape index: {}]   ;;  %s2501_s1 = inlined_call_operand.vmem [shape: bf16[784,128], index: 1, kind: input, shape index: {}]   ;;  %s2502_s2 = inlined_call_operand.vmem [shape: f32[1,128], index: 2, kind: input, shape index: {}]   ;;  %s2503_s3 = inlined_call_operand.vmem [shape: bf16[128,128], index: 3, kind: input, shape index: {}]   ;;  %s2504_s4 = inlined_call_operand.vmem [shape: f32[1,128], index: 4, kind: input, shape index: {}]   ;;  %s2505_s5 = inlined_call_operand.vmem [shape: bf16[128,128], index: 5, kind: input, shape index: {}]   ;;  %s2506_s6 = inlined_call_operand.vmem [shape: f32[1,128], index: 6, kind: input, shape index: {}]   ;;  %s2507_s7 = inlined_call_operand.hbm [shape: bf16[128,128], index: 7, kind: output, shape index: {}]  }
   0x1   :  { %14 = vsyncpa [#allocation3 + $0x1], 0  ;;  %s2120_s24 = smov 0   ;;  %s2122_s25 = smov 0  }
   0x2   :  { %s2124_s26 = smov 0   ;;  %s2126_s27 = smov 0  }
   0x3 LB: > { %s2141_s28 = sadd.s32 4294967295, %s2075_s27   ;;  %s1543_s29 = sadd.s32 4294967294, %s2075_s27   ;;  %s2075_s27 = sphi %s2126_s27, %s2513_s27   ;;  %s2071_s26 = sphi %s2124_s26, %s2512_s26   ;;  %s2067_s25 = sphi %s2122_s25, %s2511_s25   ;;  %s2063_s24 = sphi %s2120_s24, %s2510_s24  }
   0x4   : > { %s2145_s30 = sadd.s32 1, %s2075_s27   ;;  %s179_s8 = sadd.s32 1, %s2071_s26 }
   0x5   : > { %s176_s9 = ssub.s32 %s2075_s27, %s2145_s30  ;;  %p189_p0 = scmp.ne.s32.totalorder %s2071_s26, %s2067_s25 }
   0x6   : > { %p177_p1 = scmp.eq.s32.totalorder %s176_s9, 0  ;;  %p190_p2 = scmp.eq.s32.totalorder %s2141_s28, 1 }
   0x7   : > { %p195_p3 = scmp.ne.s32.totalorder %s2067_s25, %s2063_s24  ;;  %p196_p4 = scmp.eq.s32.totalorder %s1543_s29, 1 }
   0x8   : > { %s2156_s10 = scalar_select %p177_p1, %s2071_s26, %s179_s8  }
   0x9   : > { %p2158_p5 = por %p190_p2, %p189_p0  ;;  %p2162_p6 = por %p196_p4, %p195_p3 }
   0xa   : > { %p1546_p7 = scmp.ge.s32.totalorder %s2075_s27, 1  ;;  %p242_p8 = scmp.lt.s32.totalorder %s2075_s27, 3 }
   0xc   : > { %p243_p9 = pnand %p1546_p7, %p242_p8 }
   0xd   : > { %v1916_v0 = vld [vmem:[%s2501_s1 + $0x40] sm:$0xff] (!%p243_p9)   ;;  %v1920_v4 = vld [vmem:[%s2501_s1 + $0x48] sm:$0xff] (!%p243_p9)   ;;  %v1924_v8 = vld [vmem:[%s2501_s1 + $0x50] sm:$0xff] (!%p243_p9)   ;;  %s1548_s13 = sshll.u32 (!%p243_p9), %s2141_s28, 3  ;;  %vm767_vm0 = vcmask (!%p243_p9), 130048   ;;  %s272_s18 = sand.u32 (!%p243_p9), 1, %s2067_s25  }
   0xe   : > { %246 = sbr.rel (%p243_p9) target bundleno = 1102 (0x44e), region = 48  ;;  %v1917_v1 = vld [vmem:[%s2501_s1] sm:$0xff] (!%p243_p9)   ;;  %1667 = vmatprep.subr.bf16.mxu0 (!%p243_p9), %v1916_v0  ;;  %v1921_v5 = vld [vmem:[%s2501_s1 + $0x8] sm:$0xff] (!%p243_p9)   ;;  %v1925_v9 = vld [vmem:[%s2501_s1 + $0x10] sm:$0xff] (!%p243_p9)   ;;  %p276_p10 = scmp.lt.s32.totalorder (!%p243_p9), %s1548_s13, 15 }
   0xf   : > { %v1918_v2 = vld [vmem:[%s2501_s1 + $0xc0] sm:$0xff] (!%p243_p9)   ;;  %1668 = vmatpush3.bf16.msra.mxu0 (!%p243_p9), %v1917_v1  ;;  %v1922_v6 = vld [vmem:[%s2501_s1 + $0xc8] sm:$0xff] (!%p243_p9)   ;;  %v1926_v10 = vld [vmem:[%s2501_s1 + $0xd0] sm:$0xff] (!%p243_p9)   ;;  %s1643_s21 = sshll.u32 (!%p243_p9), %s2141_s28, 9  ;;  %s2459_s9 = scalar_lea.sflag (!%p243_p9), [#allocation3], %s272_s18 }
  0x10   : > { %v1919_v3 = vld [vmem:[%s2501_s1 + $0x80] sm:$0xff] (!%p243_p9)   ;;  %1707 = vmatprep.subr.bf16.mxu1 (!%p243_p9), %v1918_v2  ;;  %1669 = vmatprep.subr.bf16.mxu0 (!%p243_p9), %v1920_v4  ;;  %v1923_v7 = vld [vmem:[%s2501_s1 + $0x88] sm:$0xff] (!%p243_p9)   ;;  %v1927_v11 = vld [vmem:[%s2501_s1 + $0x90] sm:$0xff] (!%p243_p9)   ;;  %s2077_s14 = smov (!%p243_p9), [#allocation2]  }
  0x11   : > { %1708 = vmatpush3.bf16.msra.mxu1 (!%p243_p9), %v1919_v3  ;;  %v1928_v12 = vld [vmem:[%s2501_s1 + $0x58] sm:$0xff] (!%p243_p9)   ;;  %v1932_v16 = vld [vmem:[%s2501_s1 + $0x60] sm:$0xff] (!%p243_p9)   ;;  %v1936_v20 = vld [vmem:[%s2501_s1 + $0x68] sm:$0xff] (!%p243_p9)  }
  0x12   : > { %1709 = vmatprep.subr.bf16.mxu1 (!%p243_p9), %v1922_v6  ;;  %v1929_v13 = vld [vmem:[%s2501_s1 + $0x18] sm:$0xff] (!%p243_p9)   ;;  %v1933_v17 = vld [vmem:[%s2501_s1 + $0x20] sm:$0xff] (!%p243_p9)   ;;  %v1937_v21 = vld [vmem:[%s2501_s1 + $0x28] sm:$0xff] (!%p243_p9)  }
  0x13   : > { %1670 = vmatpush3.bf16.msra.mxu0 (!%p243_p9), %v1921_v5  ;;  %v1930_v14 = vld [vmem:[%s2501_s1 + $0xd8] sm:$0xff] (!%p243_p9)   ;;  %v1934_v18 = vld [vmem:[%s2501_s1 + $0xe0] sm:$0xff] (!%p243_p9)   ;;  %v1938_v22 = vld [vmem:[%s2501_s1 + $0xe8] sm:$0xff] (!%p243_p9)  }
  0x14   : > { %1671 = vmatprep.subr.bf16.mxu0 (!%p243_p9), %v1924_v8  ;;  %v1931_v15 = vld [vmem:[%s2501_s1 + $0x98] sm:$0xff] (!%p243_p9)   ;;  %v1935_v19 = vld [vmem:[%s2501_s1 + $0xa0] sm:$0xff] (!%p243_p9)   ;;  %v1939_v23 = vld [vmem:[%s2501_s1 + $0xa8] sm:$0xff] (!%p243_p9)  }
  0x15   : > { %1710 = vmatpush3.bf16.msra.mxu1 %v1923_v7  ;;  %s2515_s13 = smov (!%p276_p10, %s1548_s13), 15  ;;  %v1940_v24 = vld [vmem:[%s2501_s1 + $0x70] sm:$0xff]   ;;  %v1944_v28 = vld [vmem:[%s2501_s1 + $0x78] sm:$0xff]   ;;  %v1948_v38 = vld [vmem:[%s2501_s1 + $0x140] sm:$0xff]  }
  0x16   : > { %1711 = vmatprep.subr.bf16.mxu1 %v1926_v10  ;;  %s1874_s23 = smul.u32 56, %s2515_s13  ;;  %v1941_v25 = vld [vmem:[%s2501_s1 + $0x30] sm:$0xff]   ;;  %v1945_v29 = vld [vmem:[%s2501_s1 + $0x38] sm:$0xff]   ;;  %v1949_v42 = vld [vmem:[%s2501_s1 + $0x100] sm:$0xff]   ;;  %s1547_s13 = sshll.u32 %s272_s18, 5 }
  0x17   : > { %1672 = vmatpush3.bf16.msra.mxu0 %v1925_v9  ;;  %v1942_v26 = vld [vmem:[%s2501_s1 + $0xf0] sm:$0xff]   ;;  %v1946_v30 = vld [vmem:[%s2501_s1 + $0xf8] sm:$0xff]   ;;  %v1950_v46 = vld [vmem:[%s2501_s1 + $0x148] sm:$0xff]   ;;  %s274_s19 = scalar_lea.vmem [#allocation2], %s1547_s13 }
  0x18   : > { %1673 = vmatprep.subr.bf16.mxu0 %v1928_v12  ;;  %v1943_v27 = vld [vmem:[%s2501_s1 + $0xb0] sm:$0xff]   ;;  %s2259_s20 = scalar_lea.vmem %s2500_s0, %s1874_s23  ;;  %v1947_v34 = vld [vmem:[%s2501_s1 + $0xb8] sm:$0xff]   ;;  %v1951_v47 = vld [vmem:[%s2501_s1 + $0x108] sm:$0xff]   ;;  %s1481_s22 = sshll.u32 %s274_s19, 4  ;;  %s2455_s22 = int_to_ptr.vmem [resolvable:$true] %s1481_s22 }
  0x19   : > { %1712 = vmatpush3.bf16.msra.mxu1 %v1927_v11  ;;  %v285_v31 = vld [vmem:[%s2259_s20 + $0x8] sm:$0xff]  ;;  %v292_v32 = vld [vmem:[%s2259_s20 + $0x40] sm:$0xff]  ;;  %v291_v36 = vld [vmem:[%s2259_s20 + $0x38] sm:$0xff]  ;;  %s2453_s23 = scalar_lea.hbm %s2507_s7, %s1643_s21  ;;  %s2013_s28 = scalar_lea.vmem %s2455_s22, 512 }
  0x1a   : > { %1713 = vmatprep.subr.bf16.mxu1 %v1930_v14  ;;  %v341_v33 = vpack.c.bf16 %v292_v32, %v285_v31  ;;  %v284_v35 = vld [vmem:[%s2259_s20] sm:$0xff]  ;;  %v287_v39 = vld [vmem:[%s2259_s20 + $0x18] sm:$0xff]  ;;  %v294_v40 = vld [vmem:[%s2259_s20 + $0x50] sm:$0xff]  ;;  %p2014_p11 = scmp.ne.s32.totalorder %s2455_s22, %s2013_s28 }
  0x1b   : > { %1674 = vmatpush3.bf16.msra.mxu0 %v1929_v13  ;;  %v340_v37 = vpack.c.bf16 %v291_v36, %v284_v35  ;;  %v343_v41 = vpack.c.bf16 %v294_v40, %v287_v39  ;;  %v286_v43 = vld [vmem:[%s2259_s20 + $0x10] sm:$0xff]  ;;  %v293_v44 = vld [vmem:[%s2259_s20 + $0x48] sm:$0xff]  ;;  %v299_v48 = vld [vmem:[%s2259_s20 + $0x78] sm:$0xff] }
  0x1c   : > { %1675 = vmatprep.subr.bf16.mxu0 %v1932_v16  ;;  %812 = vmatprep.mubr.bf16.mxu0 %v341_v33  ;;  %v342_v45 = vpack.c.bf16 %v293_v44, %v286_v43  ;;  %v306_v49 = vld [vmem:[%s2259_s20 + $0xb0] sm:$0xff]  ;;  %v305_v51 = vld [vmem:[%s2259_s20 + $0xa8] sm:$0xff]  ;;  %v308_v56 = vld [vmem:[%s2259_s20 + $0xc0] sm:$0xff]  ;;  %p2015_p12 = pnand %p2014_p11, %p2158_p5 }
  0x1d   : > { %1714 = vmatpush3.bf16.msra.mxu1 %v1931_v15  ;;  %877 = vmatprep.mubr.bf16.mxu1 %v343_v41  ;;  %v298_v50 = vld [vmem:[%s2259_s20 + $0x70] sm:$0xff]  ;;  %v348_v52 = vpack.c.bf16 %v306_v49, %v299_v48  ;;  %v301_v55 = vld [vmem:[%s2259_s20 + $0x88] sm:$0xff]  ;;  %v300_v59 = vld [vmem:[%s2259_s20 + $0x80] sm:$0xff] }
  0x1e   : > { %1715 = vmatprep.subr.bf16.mxu1 %v1934_v18  ;;  %v347_v53 = vpack.c.bf16 %v305_v51, %v298_v50  ;;  %v1952_v54 = vld [vmem:[%s2501_s1 + $0x150] sm:$0xff]   ;;  %v350_v57 = vpack.c.bf16 %v308_v56, %v301_v55  ;;  %v307_v60 = vld [vmem:[%s2259_s20 + $0xb8] sm:$0xff]  ;;  %v313_v0 = vld [vmem:[%s2259_s20 + $0xe8] sm:$0xff]  ;;  %p2016_p13 = pneg %p2015_p12 }
  0x1f   : > { %1676 = vmatpush3.bf16.msra.mxu0 %v1933_v17  ;;  %v1953_v58 = vld [vmem:[%s2501_s1 + $0x110] sm:$0xff]   ;;  %v349_v61 = vpack.c.bf16 %v307_v60, %v300_v59  ;;  %v1954_v62 = vld [vmem:[%s2501_s1 + $0x158] sm:$0xff]   ;;  %v320_v1 = vld [vmem:[%s2259_s20 + $0x120] sm:$0xff] }
  0x20   : > { %1677 = vmatprep.subr.bf16.mxu0 %v1936_v20  ;;  %v1955_v63 = vld [vmem:[%s2501_s1 + $0x118] sm:$0xff]   ;;  %v355_v2 = vpack.c.bf16 %v320_v1, %v313_v0  ;;  %v312_v3 = vld [vmem:[%s2259_s20 + $0xe0] sm:$0xff]  ;;  %v322_v8 = vld [vmem:[%s2259_s20 + $0x130] sm:$0xff] }
  0x21   : > { %1716 = vmatpush3.bf16.msra.mxu1 %v1935_v19  ;;  %v319_v4 = vld [vmem:[%s2259_s20 + $0x118] sm:$0xff]  ;;  %v1956_v5 = vld [vmem:[%s2501_s1 + $0x160] sm:$0xff]   ;;  %v314_v11 = vld [vmem:[%s2259_s20 + $0xf0] sm:$0xff] }
  0x22   : > { %1717 = vmatprep.subr.bf16.mxu1 %v1938_v22  ;;  %v315_v6 = vld [vmem:[%s2259_s20 + $0xf8] sm:$0xff]  ;;  %v354_v7 = vpack.c.bf16 %v319_v4, %v312_v3  ;;  %v1957_v10 = vld [vmem:[%s2501_s1 + $0x120] sm:$0xff]   ;;  %v321_v12 = vld [vmem:[%s2259_s20 + $0x128] sm:$0xff] }
  0x23   : > { %1678 = vmatpush3.bf16.msra.mxu0 %v1937_v21  ;;  %v357_v9 = vpack.c.bf16 %v322_v8, %v315_v6  ;;  %v1958_v13 = vld [vmem:[%s2501_s1 + $0x180] sm:$0xff]   ;;  %v356_v14 = vpack.c.bf16 %v321_v12, %v314_v11  ;;  %v1959_v15 = vld [vmem:[%s2501_s1 + $0x168] sm:$0xff]   ;;  %v327_v17 = vld [vmem:[%s2259_s20 + $0x158] sm:$0xff] }
  0x24   : > { %1679 = vmatprep.subr.bf16.mxu0 %v1940_v24  ;;  %v1960_v16 = vld [vmem:[%s2501_s1 + $0x128] sm:$0xff]   ;;  %v334_v18 = vld [vmem:[%s2259_s20 + $0x190] sm:$0xff]  ;;  %v336_v24 = vld [vmem:[%s2259_s20 + $0x1a0] sm:$0xff] }
  0x25   : > { %1718 = vmatpush3.bf16.msra.mxu1 %v1939_v23  ;;  %v326_v19 = vld [vmem:[%s2259_s20 + $0x150] sm:$0xff]  ;;  %v362_v20 = vpack.c.bf16 %v334_v18, %v327_v17  ;;  %v333_v21 = vld [vmem:[%s2259_s20 + $0x188] sm:$0xff]  ;;  %v1964_v33 = vld [vmem:[%s2501_s1 + $0x138] sm:$0xff]  }
  0x26   : > { %1719 = vmatprep.subr.bf16.mxu1 %v1942_v26  ;;  %v1961_v22 = vld [vmem:[%s2501_s1 + $0x170] sm:$0xff]   ;;  %v329_v23 = vld [vmem:[%s2259_s20 + $0x168] sm:$0xff]  ;;  %v288_v35 = vld [vmem:[%s2259_s20 + $0x20] sm:$0xff] }
  0x27   : > { %1680 = vmatpush3.bf16.msra.mxu0 %v1941_v25  ;;  %v361_v25 = vpack.c.bf16 %v333_v21, %v326_v19  ;;  %v364_v26 = vpack.c.bf16 %v336_v24, %v329_v23  ;;  %v289_v32 = vld [vmem:[%s2259_s20 + $0x28] sm:$0xff]  ;;  %v303_v41 = vld [vmem:[%s2259_s20 + $0x98] sm:$0xff]  ;;  %v304_v44 = vld [vmem:[%s2259_s20 + $0xa0] sm:$0xff] }
  0x28   : > { %1681 = vmatprep.subr.bf16.mxu0 %v1944_v28  ;;  %v328_v28 = vld [vmem:[%s2259_s20 + $0x160] sm:$0xff]  ;;  %v297_v39 = vld [vmem:[%s2259_s20 + $0x68] sm:$0xff]  ;;  %v302_v50 = vld [vmem:[%s2259_s20 + $0x90] sm:$0xff] }
  0x29   : > { %1720 = vmatpush3.bf16.msra.mxu1 %v1943_v27  ;;  %v1962_v27 = vld [vmem:[%s2501_s1 + $0x130] sm:$0xff]   ;;  %v325_v48 = vld [vmem:[%s2259_s20 + $0x148] sm:$0xff]  ;;  %v332_v55 = vld [vmem:[%s2259_s20 + $0x180] sm:$0xff] }
  0x2a   : > { %1721 = vmatprep.subr.bf16.mxu1 %v1946_v30  ;;  %v1963_v30 = vld [vmem:[%s2501_s1 + $0x178] sm:$0xff]   ;;  %v309_v51 = vld [vmem:[%s2259_s20 + $0xc8] sm:$0xff]  ;;  %v316_v59 = vld [vmem:[%s2259_s20 + $0x100] sm:$0xff] }
  0x2b   : > { %1682 = vmatpush3.bf16.msra.mxu0 %v1945_v29  ;;  %v335_v29 = vld [vmem:[%s2259_s20 + $0x198] sm:$0xff]  ;;  %v337_v3 = vld [vmem:[%s2259_s20 + $0x1a8] sm:$0xff]  ;;  %v1971_v11 = vld [vmem:[%s2503_s3 + $0x30] sm:$0xff]  }
  0x2c   : > { %1747 = vmatprep.subr.bf16.mxu0 %v1948_v38  ;;  %v363_v31 = vpack.c.bf16 %v335_v29, %v328_v28  ;;  %v290_v38 = vld [vmem:[%s2259_s20 + $0x30] sm:$0xff]  ;;  %v339_v56 = vld [vmem:[%s2259_s20 + $0x1b8] sm:$0xff]  ;;  %v1966_v6 = vld [vmem:[%s2503_s3 + $0x8] sm:$0xff]  }
  0x2d   : > { %1722 = vmatpush3.bf16.msra.mxu1 %v1947_v34  ;;  %v296_v34 = vld [vmem:[%s2259_s20 + $0x60] sm:$0xff]  ;;  %v346_v40 = vpack.c.bf16 %v297_v39, %v290_v38  ;;  %v323_v60 = vld [vmem:[%s2259_s20 + $0x138] sm:$0xff]  ;;  %v1978_v18 = vld [vmem:[%s2505_s5 + $0x28] sm:$0xff]  }
  0x2e   : > { %813 = vmatmul.mubr.bf16.vlgmr.msra.gmra.mrb[0].mxu0 %v340_v37  ;;  %1816 = vmatprep.subr.bf16.mxu1 %v1958_v13  ;;  %v345_v36 = vpack.c.bf16 %v296_v34, %v289_v32  ;;  %v295_v37 = vld [vmem:[%s2259_s20 + $0x58] sm:$0xff]  ;;  %v358_v0 = vpack.c.bf16 %v323_v60, %v316_v59  ;;  %v1977_v17 = vld [vmem:[%s2505_s5 + $0x20] sm:$0xff]  }
  0x2f   : > { %1748 = vmatpush3.bf16.msra.mxu0 %v1949_v42  ;;  %820 = vmatprep.mubr.bf16.mxu0 %v348_v52  ;;  %v310_v42 = vld [vmem:[%s2259_s20 + $0xd0] sm:$0xff]  ;;  %v344_v43 = vpack.c.bf16 %v295_v37, %v288_v35  ;;  %v317_v52 = vld [vmem:[%s2259_s20 + $0x108] sm:$0xff]  ;;  %v1968_v8 = vld [vmem:[%s2503_s3 + $0x18] sm:$0xff]  }
  0x30   : > { %878 = vmatmul.mubr.bf16.vlgmr.msra.gmra.mrb[0].mxu1 %v342_v45  ;;  %1749 = vmatprep.subr.bf16.mxu0 %v1950_v46  ;;  %v311_v45 = vld [vmem:[%s2259_s20 + $0xd8] sm:$0xff]  ;;  %v352_v46 = vpack.c.bf16 %v310_v42, %v303_v41 }
  0x31   : > { %885 = vmatprep.mubr.bf16.mxu1 %v350_v57  ;;  %1817 = vmatpush3.bf16.msra.mxu1 %v1958_v13  ;;  %v353_v49 = vpack.c.bf16 %v311_v45, %v304_v44  ;;  %v351_v57 = vpack.c.bf16 %v309_v51, %v302_v50  ;;  %v1972_v12 = vld [vmem:[%s2503_s3 + $0x38] sm:$0xff]   ;;  %v1973_v13 = vld [vmem:[%s2505_s5] sm:$0xff]  }
  0x32   : > { %1850 = vmatprep.subr.bf16.mxu1 %v1973_v13 }
  0x33   : > { %1750 = vmatpush3.bf16.msra.mxu0 %v1951_v47  ;;  %v318_v47 = vld [vmem:[%s2259_s20 + $0x110] sm:$0xff] }
  0x34   : > { %1751 = vmatprep.subr.bf16.mxu0 %v1952_v54  ;;  %v360_v54 = vpack.c.bf16 %v325_v48, %v318_v47 }
  0x36   : > { %821 = vmatmul.mubr.bf16.gmra.mrb[4].mxu0 %v347_v53  ;;  %v324_v53 = vld [vmem:[%s2259_s20 + $0x140] sm:$0xff] }
  0x37   : > { %1752 = vmatpush3.bf16.msra.mxu0 %v1953_v58  ;;  %828 = vmatprep.mubr.bf16.mxu0 %v355_v2  ;;  %v359_v58 = vpack.c.bf16 %v324_v53, %v317_v52  ;;  %v330_v2 = vld [vmem:[%s2259_s20 + $0x170] sm:$0xff] }
  0x38   : > { %1753 = vmatprep.subr.bf16.mxu0 %v1954_v62  ;;  %886 = vmatmul.mubr.bf16.gmra.mrb[4].mxu1 %v349_v61  ;;  %v367_v61 = vpack.c.bf16 %v339_v56, %v332_v55  ;;  %v331_v62 = vld [vmem:[%s2259_s20 + $0x178] sm:$0xff]  ;;  %v365_v4 = vpack.c.bf16 %v337_v3, %v330_v2 }
  0x39   : > { %893 = vmatprep.mubr.bf16.mxu1 %v357_v9  ;;  %v1969_v9 = vld [vmem:[%s2503_s3 + $0x20] sm:$0xff]  }
  0x3b   : > { %1754 = vmatpush3.bf16.msra.mxu0 %v1955_v63  ;;  %v338_v63 = vld [vmem:[%s2259_s20 + $0x1b0] sm:$0xff]  ;;  %s2017_s20 = sshll.u32 %s2077_s14, 4  ;;  %s2018_s20 = int_to_ptr.vmem [resolvable:$false] %s2017_s20 }
  0x3c   : > { %1755 = vmatprep.subr.bf16.mxu0 %v1956_v5  ;;  %v366_v1 = vpack.c.bf16 %v338_v63, %v331_v62  ;;  %v1965_v5 = vld [vmem:[%s2503_s3] sm:$0xff]   ;;  %s2019_s15 = scalar_lea.vmem %s2018_s20, 1024  ;;  %p2020_p0 = scmp.lt.s32.totalorder %s2455_s22, %s2018_s20 }
  0x3d   : > { %p2021_p1 = scmp.lt.s32.totalorder %s2019_s15, %s2013_s28 }
  0x3e   : > { %829 = vmatmul.mubr.bf16.gmra.mrb[8].mxu0 %v354_v7  ;;  %v1967_v7 = vld [vmem:[%s2503_s3 + $0x10] sm:$0xff]  }
  0x3f   : > { %1756 = vmatpush3.bf16.msra.mxu0 %v1957_v10  ;;  %836 = vmatprep.mubr.bf16.mxu0 %v362_v20  ;;  %v1970_v10 = vld [vmem:[%s2503_s3 + $0x28] sm:$0xff]   ;;  %v1550_v20 = vld [vmem:[%s2502_s2] ss:$0 sm:$0xff]  ;;  %p2022_p2 = por %p2021_p1, %p2020_p0 }
  0x40   : > { %1757 = vmatprep.subr.bf16.mxu0 %v1959_v15  ;;  %894 = vmatmul.mubr.bf16.gmra.mrb[8].mxu1 %v356_v14  ;;  %v1974_v14 = vld [vmem:[%s2505_s5 + $0x8] sm:$0xff]   ;;  %v1975_v15 = vld [vmem:[%s2505_s5 + $0x10] sm:$0xff]  }
  0x41   : > { %901 = vmatprep.mubr.bf16.mxu1 %v364_v26  ;;  %p2023_p3 = pnand %p2022_p2, %p2016_p13 }
  0x43   : > { %1758 = vmatpush3.bf16.msra.mxu0 %v1960_v16  ;;  %v1976_v16 = vld [vmem:[%s2505_s5 + $0x18] sm:$0xff]  }
  0x44   : > { %1759 = vmatprep.subr.bf16.mxu0 %v1961_v22 }
  0x46   : > { %837 = vmatmul.mubr.bf16.gmra.mrb[12].mxu0 %v361_v25 }
  0x47   : > { %1760 = vmatpush3.bf16.msra.mxu0 %v1962_v27  ;;  %942 = vmatprep.mubr.bf16.mxu0 %v345_v36 }
  0x48   : > { %1761 = vmatprep.subr.bf16.mxu0 %v1963_v30  ;;  %902 = vmatmul.mubr.bf16.gmra.mrb[12].mxu1 %v363_v31 }
  0x49   : > { %1818 = vmatprep.mubr.msk.bf16.mxu1 %vm767_vm0, %v346_v40 }
  0x4b   : > { %1762 = vmatpush3.bf16.msra.mxu0 %v1964_v33 }
  0x4c   : > { %1826 = vmatprep.subr.bf16.mxu0 %v1965_v5 }
  0x4e   : > { %943 = vmatmul.mubr.bf16.vlgmr.msra.gmra.mrb[16].mxu0 %v344_v43 }
  0x4f   : > { %950 = vmatprep.mubr.bf16.mxu0 %v352_v46  ;;  %1827 = vmatpush3.bf16.msra.mxu0 %v1965_v5 }
  0x50   : > { %1819 = vmatmul.mubr.msk.bf16.vlgmr.msra.gmra.mrb[16].mxu1 %vm767_vm0, %v353_v49  ;;  %1828 = vmatprep.subr.bf16.mxu0 %v1966_v6 }
  0x51   : > { %1822 = vmatprep.mubr.msk.bf16.mxu1 %vm767_vm0, %v360_v54  ;;  %1851 = vmatpush3.bf16.msra.mxu1 %v1973_v13 }
  0x52   : > { %1852 = vmatprep.subr.bf16.mxu1 %v1974_v14 }
  0x53   : > { %1829 = vmatpush3.bf16.msra.mxu0 %v1966_v6 }
  0x54   : > { %1830 = vmatprep.subr.bf16.mxu0 %v1967_v7 }
  0x55   : > { %1853 = vmatpush3.bf16.msra.mxu1 %v1974_v14 }
  0x56   : > { %951 = vmatmul.mubr.bf16.gmra.mrb[20].mxu0 %v351_v57  ;;  %1854 = vmatprep.subr.bf16.mxu1 %v1975_v15 }
  0x57   : > { %958 = vmatprep.mubr.bf16.mxu0 %v359_v58  ;;  %1831 = vmatpush3.bf16.msra.mxu0 %v1967_v7 }
  0x58   : > { %1823 = vmatmul.mubr.msk.bf16.gmra.mrb[20].mxu1 %vm767_vm0, %v367_v61  ;;  %1832 = vmatprep.subr.bf16.mxu0 %v1968_v8 }
  0x59   : > { %1855 = vmatpush3.bf16.msra.mxu1 %v1975_v15 }
  0x5a   : > { %1856 = vmatprep.subr.bf16.mxu1 %v1976_v16 }
  0x5b   : > { %1833 = vmatpush3.bf16.msra.mxu0 %v1968_v8 }
  0x5c   : > { %1834 = vmatprep.subr.bf16.mxu0 %v1969_v9 }
  0x5d   : > { %1857 = vmatpush3.bf16.msra.mxu1 %v1976_v16 }
  0x5e   : > { %959 = vmatmul.mubr.bf16.gmra.mrb[24].mxu0 %v358_v0  ;;  %1858 = vmatprep.subr.bf16.mxu1 %v1977_v17 }
  0x5f   : > { %966 = vmatprep.mubr.bf16.mxu0 %v366_v1  ;;  %1835 = vmatpush3.bf16.msra.mxu0 %v1969_v9 }
  0x60   : > { %1836 = vmatprep.subr.bf16.mxu0 %v1970_v10 }
  0x61   : > { %1859 = vmatpush3.bf16.msra.mxu1 %v1977_v17 }
  0x62   : > { %1860 = vmatprep.subr.bf16.mxu1 %v1978_v18 }
  0x63   : > { %1837 = vmatpush3.bf16.msra.mxu0 %v1970_v10 }
  0x64   : > { %1838 = vmatprep.subr.bf16.mxu0 %v1971_v11 }
  0x65   : > { %1861 = vmatpush3.bf16.msra.mxu1 %v1978_v18 }
  0x66   : > { %967 = vmatmul.mubr.bf16.gmra.mrb[28].mxu0 %v365_v4 }
  0x67   : > { %1839 = vmatpush3.bf16.msra.mxu0 %v1971_v11 }
  0x68   : > { %1840 = vmatprep.subr.bf16.mxu0 %v1972_v12 }
  0x6b   : > { %1841 = vmatpush3.bf16.msra.mxu0 %v1972_v12 }
 0x101   : > { %v1683_v19 = vpop.f32.mrb[0].mxu0 }
 0x102   : > { %v1684_v21 = vpop.f32.mrb[1].mxu0 }
 0x103   : > { %v1685_v22 = vadd.f32 %v1684_v21, %v1683_v19  ;;  %v1686_v23 = vpop.f32.mrb[2].mxu0  ;;  %v1723_v24 = vpop.f32.mrb[0].mxu1 }
 0x104   : > { %v1687_v25 = vpop.f32.mrb[3].mxu0  ;;  %v1724_v28 = vpop.f32.mrb[1].mxu1 }
 0x105   : > { %v815_v26 = vadd.f32 %v1685_v22, %v1550_v20  ;;  %v1688_v27 = vadd.f32 %v1687_v25, %v1686_v23  ;;  %v1725_v29 = vadd.f32 %v1724_v28, %v1723_v24  ;;  %v1726_v30 = vpop.f32.mrb[2].mxu1 }
 0x106   : > { %v1727_v32 = vpop.f32.mrb[3].mxu1 }
 0x107   : > { %v818_v31 = vadd.f32 %v1688_v27, %v1550_v20  ;;  %v880_v33 = vadd.f32 %v1725_v29, %v815_v26  ;;  %v1728_v34 = vadd.f32 %v1727_v32, %v1726_v30 }
 0x109   : > { %v1689_v35 = vpop.f32.mrb[4].mxu0  ;;  %v883_v36 = vadd.f32 %v1728_v34, %v818_v31 }
 0x10a   : > { %v1690_v37 = vpop.f32.mrb[5].mxu0 }
 0x10b   : > { %v1691_v38 = vadd.f32 %v1690_v37, %v1689_v35  ;;  %v1692_v39 = vpop.f32.mrb[6].mxu0  ;;  %v1729_v40 = vpop.f32.mrb[4].mxu1 }
 0x10c   : > { %v1693_v41 = vpop.f32.mrb[7].mxu0  ;;  %v1730_v44 = vpop.f32.mrb[5].mxu1 }
 0x10d   : > { %v823_v42 = vadd.f32 %v1691_v38, %v1550_v20  ;;  %v1694_v43 = vadd.f32 %v1693_v41, %v1692_v39  ;;  %v1731_v45 = vadd.f32 %v1730_v44, %v1729_v40  ;;  %v1732_v46 = vpop.f32.mrb[6].mxu1 }
 0x10e   : > { %v1733_v48 = vpop.f32.mrb[7].mxu1 }
 0x10f   : > { %v826_v47 = vadd.f32 %v1694_v43, %v1550_v20  ;;  %v888_v49 = vadd.f32 %v1731_v45, %v823_v42  ;;  %v1734_v50 = vadd.f32 %v1733_v48, %v1732_v46 }
 0x111   : > { %v1695_v51 = vpop.f32.mrb[8].mxu0  ;;  %v891_v52 = vadd.f32 %v1734_v50, %v826_v47 }
 0x112   : > { %v1696_v53 = vpop.f32.mrb[9].mxu0 }
 0x113   : > { %v1697_v54 = vadd.f32 %v1696_v53, %v1695_v51  ;;  %v1698_v55 = vpop.f32.mrb[10].mxu0  ;;  %v1735_v56 = vpop.f32.mrb[8].mxu1 }
 0x114   : > { %v1699_v57 = vpop.f32.mrb[11].mxu0  ;;  %v1736_v60 = vpop.f32.mrb[9].mxu1 }
 0x115   : > { %v831_v58 = vadd.f32 %v1697_v54, %v1550_v20  ;;  %v1700_v59 = vadd.f32 %v1699_v57, %v1698_v55  ;;  %v1737_v61 = vadd.f32 %v1736_v60, %v1735_v56  ;;  %v1738_v62 = vpop.f32.mrb[10].mxu1 }
 0x116   : > { %v1739_v0 = vpop.f32.mrb[11].mxu1 }
 0x117   : > { %v834_v63 = vadd.f32 %v1700_v59, %v1550_v20  ;;  %v896_v1 = vadd.f32 %v1737_v61, %v831_v58  ;;  %v1740_v2 = vadd.f32 %v1739_v0, %v1738_v62 }
 0x119   : > { %v1701_v3 = vpop.f32.mrb[12].mxu0  ;;  %v899_v4 = vadd.f32 %v1740_v2, %v834_v63 }
 0x11a   : > { %v1702_v5 = vpop.f32.mrb[13].mxu0 }
 0x11b   : > { %v1703_v6 = vadd.f32 %v1702_v5, %v1701_v3  ;;  %v1704_v7 = vpop.f32.mrb[14].mxu0  ;;  %v1741_v8 = vpop.f32.mrb[12].mxu1 }
 0x11c   : > { %v1705_v9 = vpop.f32.mrb[15].mxu0  ;;  %v1742_v12 = vpop.f32.mrb[13].mxu1 }
 0x11d   : > { %v839_v10 = vadd.f32 %v1703_v6, %v1550_v20  ;;  %v1706_v11 = vadd.f32 %v1705_v9, %v1704_v7  ;;  %v1743_v13 = vadd.f32 %v1742_v12, %v1741_v8  ;;  %v1744_v14 = vpop.f32.mrb[14].mxu1 }
 0x11e   : > { %v1745_v16 = vpop.f32.mrb[15].mxu1 }
 0x11f   : > { %v842_v15 = vadd.f32 %v1706_v11, %v1550_v20  ;;  %v904_v17 = vadd.f32 %v1743_v13, %v839_v10  ;;  %v1746_v18 = vadd.f32 %v1745_v16, %v1744_v14 }
 0x121   : > { %v1763_v19 = vpop.f32.mrb[16].mxu0  ;;  %v907_v21 = vadd.f32 %v1746_v18, %v842_v15  ;;  %v1980_v18 = vld [vmem:[%s2505_s5 + $0x38] sm:$0xff]  }
 0x122   : > { %v1764_v22 = vpop.f32.mrb[17].mxu0 }
 0x123   : > { %v1765_v23 = vadd.f32 %v1764_v22, %v1763_v19  ;;  %v1766_v24 = vpop.f32.mrb[18].mxu0  ;;  %v1820_v26 = vpop.f32.mrb[16].mxu1 }
 0x124   : > { %v1767_v25 = vpop.f32.mrb[19].mxu0  ;;  %v1009_v29 = vpop.f32.mrb[17].mxu1 }
 0x125   : > { %v1768_v27 = vadd.f32 %v1767_v25, %v1766_v24  ;;  %v945_v28 = vadd.f32 %v1765_v23, %v880_v33  ;;  %v1821_v30 = vpop.f32.mrb[18].mxu1 }
 0x126   : > { %v1012_v34 = vpop.f32.mrb[19].mxu1 }
 0x127   : > { %v1010_v31 = vadd.f32 %v1009_v29, %v945_v28  ;;  %v948_v32 = vadd.f32 %v1768_v27, %v883_v36 }
 0x129   : > { %v1013_v35 = vadd.f32 %v1012_v34, %v948_v32  ;;  %v1769_v37 = vpop.f32.mrb[20].mxu0  ;;  %v1040_v38 = vmax.f32 %v1010_v31, 0.0 }
 0x12a   : > { %v1770_v20 = vpop.f32.mrb[21].mxu0 }
 0x12b   : > { %v1041_v39 = vmax.f32 %v1013_v35, 0.0  ;;  %v1771_v40 = vadd.f32 %v1770_v20, %v1769_v37  ;;  %v1772_v41 = vpop.f32.mrb[22].mxu0  ;;  %v1824_v43 = vpop.f32.mrb[20].mxu1 }
 0x12c   : > { %v1773_v42 = vpop.f32.mrb[23].mxu0  ;;  %v1025_v47 = vpop.f32.mrb[21].mxu1 }
 0x12d   : > { %v1048_v44 = vpack.c.bf16 %v1041_v39, %v1040_v38  ;;  %v953_v45 = vadd.f32 %v1771_v40, %v888_v49  ;;  %v1774_v46 = vadd.f32 %v1773_v42, %v1772_v41  ;;  %v1825_v48 = vpop.f32.mrb[22].mxu1 }
 0x12e   : > { %v1028_v51 = vpop.f32.mrb[23].mxu1 }
 0x12f   : > { %v1018_v33 = vadd.f32 %v1820_v26, %v953_v45  ;;  %v956_v50 = vadd.f32 %v1774_v46, %v891_v52  ;;  %1842 = vmatprep.mubr.bf16.mxu0 %v1048_v44 }
 0x131   : > { %v1021_v36 = vadd.f32 %v1821_v30, %v956_v50  ;;  %v1775_v53 = vpop.f32.mrb[24].mxu0  ;;  %v1042_v55 = vmax.f32 %v1018_v33, 0.0  ;;  %v1344_v33 = vlaneseq  ;;  %v1613_v50 = vld [vmem:[%s2506_s6] ss:$0 sm:$0xff] }
 0x132   : > { %v1776_v54 = vpop.f32.mrb[25].mxu0 }
 0x133   : > { %v1043_v56 = vmax.f32 %v1021_v36, 0.0  ;;  %v1777_v57 = vadd.f32 %v1776_v54, %v1775_v53  ;;  %v1778_v58 = vpop.f32.mrb[26].mxu0 }
 0x134   : > { %v1779_v59 = vpop.f32.mrb[27].mxu0 }
 0x135   : > { %v1049_v60 = vpack.c.bf16 %v1043_v56, %v1042_v55  ;;  %v1780_v61 = vadd.f32 %v1779_v59, %v1778_v58  ;;  %v961_v62 = vadd.f32 %v1777_v57, %v896_v1 }
 0x137   : > { %v1026_v63 = vadd.f32 %v1025_v47, %v961_v62  ;;  %1843 = vmatmul.mubr.bf16.vlgmr.msra.gmra.mrb[32].mxu0 %v1049_v60  ;;  %v964_v49 = vadd.f32 %v1780_v61, %v899_v4  ;;  %v1979_v4 = vld [vmem:[%s2505_s5 + $0x30] sm:$0xff]  }
 0x138   : > { %1862 = vmatprep.subr.bf16.mxu1 %v1979_v4 }
 0x139   : > { %v1029_v0 = vadd.f32 %v1028_v51, %v964_v49  ;;  %v1781_v2 = vpop.f32.mrb[28].mxu0  ;;  %v1044_v52 = vmax.f32 %v1026_v63, 0.0  ;;  %1863 = vmatpush3.bf16.msra.mxu1 %v1979_v4  ;;  %v1345_v51 = vand.u32 127, %v1344_v33 }
 0x13a   : > { %v1782_v3 = vpop.f32.mrb[29].mxu0  ;;  %1864 = vmatprep.subr.bf16.mxu1 %v1980_v18 }
 0x13b   : > { %v1045_v5 = vmax.f32 %v1029_v0, 0.0  ;;  %v1783_v6 = vadd.f32 %v1782_v3, %v1781_v2  ;;  %v1784_v7 = vpop.f32.mrb[30].mxu0  ;;  %vm1346_vm1 = vcmp.lt.s32.totalorder %v1345_v51, 10 }
 0x13c   : > { %v1785_v8 = vpop.f32.mrb[31].mxu0 }
 0x13d   : > { %v1050_v9 = vpack.c.bf16 %v1045_v5, %v1044_v52  ;;  %v969_v10 = vadd.f32 %v1783_v6, %v904_v17  ;;  %v1786_v11 = vadd.f32 %v1785_v8, %v1784_v7  ;;  %1865 = vmatpush3.bf16.msra.mxu1 %v1980_v18  ;;  %v1604_v17 = vld [vmem:[%s2504_s4] ss:$0 sm:$0xff] }
 0x13f   : > { %v1034_v12 = vadd.f32 %v1824_v43, %v969_v10  ;;  %v972_v13 = vadd.f32 %v1786_v11, %v907_v21  ;;  %1846 = vmatprep.mubr.bf16.mxu0 %v1050_v9 }
 0x141   : > { %v1037_v14 = vadd.f32 %v1825_v48, %v972_v13  ;;  %v1046_v15 = vmax.f32 %v1034_v12, 0.0 }
 0x143   : > { %v1047_v1 = vmax.f32 %v1037_v14, 0.0 }
 0x145   : > { %v1051_v16 = vpack.c.bf16 %v1047_v1, %v1046_v15 }
 0x147   : > { %1847 = vmatmul.mubr.bf16.gmra.mrb[36].mxu0 %v1051_v16 }
 0x20a   : > { %v1844_v19 = vpop.f32.mrb[32].mxu0 }
 0x20b   : > { %v1166_v21 = vadd.f32 %v1844_v19, %v1604_v17  ;;  %v1157_v22 = vpop.f32.mrb[33].mxu0 }
 0x20c   : > { %v1158_v23 = vadd.f32 %v1604_v17, %v1157_v22  ;;  %v1845_v24 = vpop.f32.mrb[34].mxu0 }
 0x20d   : > { %v1169_v25 = vadd.f32 %v1845_v24, %v1604_v17  ;;  %v1160_v26 = vpop.f32.mrb[35].mxu0  ;;  %v1190_v28 = vmax.f32 %v1166_v21, 0.0 }
 0x20e   : > { %v1161_v27 = vadd.f32 %v1604_v17, %v1160_v26  ;;  %v1188_v30 = vmax.f32 %v1158_v23, 0.0 }
 0x20f   : > { %v1191_v29 = vmax.f32 %v1169_v25, 0.0 }
 0x210   : > { %v1189_v31 = vmax.f32 %v1161_v27, 0.0 }
 0x211   : > { %v1197_v32 = vpack.c.bf16 %v1191_v29, %v1190_v28 }
 0x212   : > { %v1196_v34 = vpack.c.bf16 %v1189_v31, %v1188_v30 }
 0x214   : > { %1866 = vmatprep.mubr.bf16.mxu1 %v1196_v34 }
 0x215   : > { %1867 = vmatmul.mubr.bf16.vlgmr.msra.gmra.mrb[24].mxu1 %v1197_v32 }
 0x21a   : > { %v1848_v35 = vpop.f32.mrb[36].mxu0 }
 0x21b   : > { %v1182_v37 = vadd.f32 %v1848_v35, %v1604_v17  ;;  %v1173_v20 = vpop.f32.mrb[37].mxu0 }
 0x21c   : > { %v1174_v38 = vadd.f32 %v1604_v17, %v1173_v20  ;;  %v1849_v39 = vpop.f32.mrb[38].mxu0 }
 0x21d   : > { %v1185_v40 = vadd.f32 %v1849_v39, %v1604_v17  ;;  %v1176_v41 = vpop.f32.mrb[39].mxu0  ;;  %v1194_v43 = vmax.f32 %v1182_v37, 0.0 }
 0x21e   : > { %v1177_v42 = vadd.f32 %v1604_v17, %v1176_v41  ;;  %v1192_v45 = vmax.f32 %v1174_v38, 0.0 }
 0x21f   : > { %v1195_v44 = vmax.f32 %v1185_v40, 0.0 }
 0x220   : > { %v1193_v46 = vmax.f32 %v1177_v42, 0.0 }
 0x221   : > { %v1199_v47 = vpack.c.bf16 %v1195_v44, %v1194_v43 }
 0x222   : > { %v1198_v48 = vpack.c.bf16 %v1193_v46, %v1192_v45 }
 0x224   : > { %1870 = vmatprep.mubr.bf16.mxu1 %v1198_v48 }
 0x225   : > { %1871 = vmatmul.mubr.bf16.gmra.mrb[28].mxu1 %v1199_v47 }
 0x2e8   : > { %v1868_v36 = vpop.f32.mrb[24].mxu1 }
 0x2e9   : > { %v1314_v53 = vadd.f32 %v1868_v36, %v1613_v50  ;;  %v1305_v54 = vpop.f32.mrb[25].mxu1 }
 0x2ea   : > { %v1306_v55 = vadd.f32 %v1613_v50, %v1305_v54  ;;  %v1869_v56 = vpop.f32.mrb[26].mxu1 }
 0x2eb   : > { %v1338_v57 = vmax.f32 %v1314_v53, 0.0  ;;  %v1317_v58 = vadd.f32 %v1869_v56, %v1613_v50  ;;  %v1308_v59 = vpop.f32.mrb[27].mxu1 }
 0x2ec   : > { %v1336_v60 = vmax.f32 %v1306_v55, 0.0  ;;  %v1309_v61 = vadd.f32 %v1613_v50, %v1308_v59 }
 0x2ed   : > { %v1339_v62 = vmax.f32 %v1317_v58, 0.0  ;;  %v1349_v63 = vsel %vm1346_vm1, %v1338_v57, -1e+30 }
 0x2ee   : > { %v1337_v49 = vmax.f32 %v1309_v61, 0.0  ;;  %1359 = vmax.xlane.f32.xlu1 %v1349_v63  ;;  %v1347_v0 = vsel %vm1346_vm1, %v1336_v60, -1e+30 }
 0x2ef   : > { %1355 = vmax.xlane.f32.xlu0 %v1347_v0  ;;  %v1350_v2 = vsel %vm1346_vm1, %v1339_v62, -1e+30 }
 0x2f0   : > { %v1348_v3 = vsel %vm1346_vm1, %v1337_v49, -1e+30 }
 0x2f2   : > { %1361 = vmax.xlane.f32.xlu1 %v1350_v2 }
 0x2f3   : > { %1357 = vmax.xlane.f32.xlu0 %v1348_v3 }
 0x2f8   : > { %v1872_v52 = vpop.f32.mrb[28].mxu1 }
 0x2f9   : > { %v1321_v5 = vpop.f32.mrb[29].mxu1  ;;  %v1330_v6 = vadd.f32 %v1872_v52, %v1613_v50 }
 0x2fa   : > { %v1322_v7 = vadd.f32 %v1613_v50, %v1321_v5  ;;  %v1873_v8 = vpop.f32.mrb[30].mxu1 }
 0x2fb   : > { %v1324_v9 = vpop.f32.mrb[31].mxu1  ;;  %v1333_v11 = vadd.f32 %v1873_v8, %v1613_v50  ;;  %v1342_v13 = vmax.f32 %v1330_v6, 0.0 }
 0x2fc   : > { %v1340_v10 = vmax.f32 %v1322_v7, 0.0  ;;  %v1325_v12 = vadd.f32 %v1613_v50, %v1324_v9 }
 0x2fd   : > { %v1343_v1 = vmax.f32 %v1333_v11, 0.0  ;;  %v1353_v4 = vsel %vm1346_vm1, %v1342_v13, -1e+30 }
 0x2fe   : > { %v1341_v14 = vmax.f32 %v1325_v12, 0.0  ;;  %v1351_v15 = vsel %vm1346_vm1, %v1340_v10, -1e+30 }
 0x2ff   : > { %1363 = vmax.xlane.f32.xlu0 %v1351_v15  ;;  %v1354_v18 = vsel %vm1346_vm1, %v1343_v1, -1e+30 }
 0x300   : > { %v1352_v16 = vsel %vm1346_vm1, %v1341_v14, -1e+30 }
 0x301   : > { %1365 = vmax.xlane.f32.xlu1 %v1352_v16 }
 0x303   : > { %1367 = vmax.xlane.f32.xlu0 %v1353_v4 }
 0x305   : > { %1369 = vmax.xlane.f32.xlu1 %v1354_v18 }
 0x37b   : > { %v1360_v17 = vpop.xlane.xlu1 %1359 }
 0x37c   : > { %v1373_v19 = vsub.f32 %v1349_v63, %v1360_v17  ;;  %v1356_v21 = vpop.xlane.xlu0 %1355 }
 0x37d   : > { %v1371_v22 = vsub.f32 %v1347_v0, %v1356_v21 }
 0x37e   : > { %v1383_v23 = vmul.f32 1.442695, %v1373_v19 }
 0x37f   : > { %v1379_v24 = vmul.f32 1.442695, %v1371_v22  ;;  %v1362_v25 = vpop.xlane.xlu1 %1361 }
 0x380   : > { %1981 = vpow2.f32 %v1383_v23  ;;  %v1374_v26 = vsub.f32 %v1350_v2, %v1362_v25  ;;  %v1358_v27 = vpop.xlane.xlu0 %1357 }
 0x381   : > { %v1372_v28 = vsub.f32 %v1348_v3, %v1358_v27  ;;  %1983 = vpow2.f32 %v1379_v24 }
 0x382   : > { %v1385_v29 = vmul.f32 1.442695, %v1374_v26 }
 0x383   : > { %v1381_v30 = vmul.f32 1.442695, %v1372_v28 }
 0x384   : > { %1985 = vpow2.f32 %v1385_v29 }
 0x385   : > { %1987 = vpow2.f32 %v1381_v30 }
 0x38a   : > { %v1982_v31 = vpop.eup %1981 }
 0x38b   : > { %1399 = vadd.xlane.f32.xlu0 %v1982_v31  ;;  %v1984_v34 = vpop.eup %1983 }
 0x38c   : > { %v1364_v32 = vpop.xlane.xlu0 %1363 }
 0x38d   : > { %v1375_v35 = vsub.f32 %v1351_v15, %v1364_v32 }
 0x38e   : > { %v1986_v37 = vpop.eup %1985  ;;  %v1366_v20 = vpop.xlane.xlu1 %1365 }
 0x38f   : > { %v1387_v38 = vmul.f32 1.442695, %v1375_v35  ;;  %v1376_v39 = vsub.f32 %v1352_v16, %v1366_v20  ;;  %1401 = vadd.xlane.f32.xlu1 %v1986_v37  ;;  %1395 = vadd.xlane.f32.xlu0 %v1984_v34  ;;  %v1988_v43 = vpop.eup %1987 }
 0x390   : > { %v1368_v40 = vpop.xlane.xlu0 %1367 }
 0x391   : > { %1989 = vpow2.f32 %v1387_v38  ;;  %v1389_v41 = vmul.f32 1.442695, %v1376_v39  ;;  %v1377_v42 = vsub.f32 %v1353_v4, %v1368_v40 }
 0x392   : > { %v1370_v44 = vpop.xlane.xlu1 %1369 }
 0x393   : > { %1991 = vpow2.f32 %v1389_v41  ;;  %v1391_v45 = vmul.f32 1.442695, %v1377_v42  ;;  %v1378_v46 = vsub.f32 %v1354_v18, %v1370_v44  ;;  %1397 = vadd.xlane.f32.xlu1 %v1988_v43 }
 0x395   : > { %1993 = vpow2.f32 %v1391_v45  ;;  %v1393_v47 = vmul.f32 1.442695, %v1378_v46 }
 0x397   : > { %1995 = vpow2.f32 %v1393_v47 }
 0x39b   : > { %v1990_v48 = vpop.eup %1989 }
 0x39c   : > { %1403 = vadd.xlane.f32.xlu0 %v1990_v48 }
 0x39d   : > { %v1992_v33 = vpop.eup %1991 }
 0x39e   : > { %1405 = vadd.xlane.f32.xlu1 %v1992_v33 }
 0x39f   : > { %v1994_v50 = vpop.eup %1993 }
 0x3a0   : > { %1407 = vadd.xlane.f32.xlu0 %v1994_v50 }
 0x3a1   : > { %v1996_v51 = vpop.eup %1995 }
 0x3a2   : > { %1409 = vadd.xlane.f32.xlu1 %v1996_v51 }
 0x418   : > { %v1400_v36 = vpop.xlane.xlu0 %1399 }
 0x419   : > { %1997 = vrcp.f32 %v1400_v36 }
 0x41c   : > { %v1402_v53 = vpop.xlane.xlu1 %1401  ;;  %v1396_v54 = vpop.xlane.xlu0 %1395 }
 0x41d   : > { %1999 = vrcp.f32 %v1402_v53 }
 0x41e   : > { %2001 = vrcp.f32 %v1396_v54 }
 0x420   : > { %v1398_v55 = vpop.xlane.xlu1 %1397 }
 0x421   : > { %2003 = vrcp.f32 %v1398_v55 }
 0x423   : > { %v1998_v56 = vpop.eup %1997 }
 0x424   : > { %v1421_v58 = vmul.f32 %v1998_v56, %v1982_v31 }
 0x427   : > { %v2000_v57 = vpop.eup %1999 }
 0x428   : > { %v1422_v59 = vmul.f32 %v2000_v57, %v1986_v37  ;;  %v2002_v60 = vpop.eup %2001 }
 0x429   : > { %v1404_v61 = vpop.xlane.xlu0 %1403  ;;  %v1419_v0 = vmul.f32 %v2002_v60, %v1984_v34 }
 0x42a   : > { %v1652_v62 = vpack.c.bf16 %v1422_v59, %v1421_v58  ;;  %2005 = vrcp.f32 %v1404_v61 }
 0x42b   : > { %v2004_v63 = vpop.eup %2003  ;;  %v1406_v49 = vpop.xlane.xlu1 %1405 }
 0x42c   : > { %1664 = vst [vmem:[%s274_s19 + $0x8] sm:$0xff] %v1652_v62   ;;  %v1420_v2 = vmul.f32 %v2004_v63, %v1988_v43  ;;  %2007 = vrcp.f32 %v1406_v49 }
 0x42d   : > { %v1408_v3 = vpop.xlane.xlu0 %1407 }
 0x42e   : > { %v1647_v52 = vpack.c.bf16 %v1420_v2, %v1419_v0  ;;  %2009 = vrcp.f32 %v1408_v3 }
 0x42f   : > { %v1410_v5 = vpop.xlane.xlu1 %1409 }
 0x430   : > { %1648 = vst [vmem:[%s274_s19] sm:$0xff] %v1647_v52   ;;  %2011 = vrcp.f32 %v1410_v5 }
 0x434   : > { %v2006_v6 = vpop.eup %2005 }
 0x435   : > { %v1423_v8 = vmul.f32 %v2006_v6, %v1990_v48 }
 0x436   : > { %v2008_v7 = vpop.eup %2007 }
 0x437   : > { %v1424_v9 = vmul.f32 %v2008_v7, %v1992_v33 }
 0x438   : > { %v2010_v10 = vpop.eup %2009 }
 0x439   : > { %v1657_v11 = vpack.c.bf16 %v1424_v9, %v1423_v8  ;;  %v1425_v13 = vmul.f32 %v2010_v10, %v1994_v50 }
 0x43a   : > { %v2012_v12 = vpop.eup %2011 }
 0x43b   : > { %1665 = vst [vmem:[%s274_s19 + $0x10] sm:$0xff] %v1657_v11   ;;  %v1426_v14 = vmul.f32 %v2012_v12, %v1996_v51 }
 0x43d   : > { %v1662_v15 = vpack.c.bf16 %v1426_v14, %v1425_v13 }
 0x43f   : > { %1666 = vst [vmem:[%s274_s19 + $0x18] sm:$0xff] %v1662_v15  }
 0x440   : > { %2026 = shalt.err (!%p2023_p3)
}
 0x441   : > { %s2027_s16 = scalar_lea.hbm %s2453_s23, 512  ;;  %s2031_s13 = scalar_lea.hbm %s2507_s7, 1024 }
 0x442   : > { %p2028_p4 = scmp.ne.s32.totalorder %s2453_s23, %s2027_s16  ;;  %p2032_p9 = scmp.lt.u32.totalorder %s2453_s23, %s2507_s7 }
 0x443   : > { %p2033_p10 = scmp.lt.u32.totalorder %s2031_s13, %s2027_s16  ;;  %p2035_p12 = scmp.lt.u32.totalorder %s2027_s16, %s2453_s23 }
 0x444   : > { %p2029_p7 = pnand %p2028_p4, %p2158_p5 }
 0x445   : > { %p2034_p11 = por %p2033_p10, %p2032_p9 }
 0x446   : > { %p2030_p8 = pneg %p2029_p7 }
 0x447   : > { %p2036_p13 = por %p2035_p12, %p2034_p11 }
 0x449   : > { %p2037_p0 = pnand %p2036_p13, %p2030_p8 }
 0x44b   : > { %2040 = shalt.err (!%p2037_p0)
}
 0x44c   : > { %s2078_s29 = smov 64   ;;  %s2079_s8 = smov 4  }
 0x44d   : > { %1875 = dma.vmem_to_hbm [thread:$0]  (%p2158_p5), %s2455_s22, 512, %s2453_s23, %s2459_s9, %s2078_s29, %s2078_s29, %s2079_s8  }
 0x44e PF: > { %p1881_p1 = scmp.ge.s32.totalorder %s2075_s27, 2  ;;  %s1496_s28 = sand.u32 1, %s2063_s24  }
 0x44f   : > { %s1497_s14 = scalar_lea.sflag [#allocation3], %s1496_s28 }
 0x450   : > { %p1878_p2 = pnand %p1881_p1, %p2162_p6 }
 0x452   : > { %2058 = dma.done.wait (!%p1878_p2), %s1497_s14, 512  }
 0x453   : > { %2060 = vsyncadd (!%p1878_p2), %s1497_s14, 4294966784  ;;  %p17_p3 = scmp.ge.s32.totalorder %s2145_s30, 4   ;;  %s2510_s24 = smov %s2067_s25 }
 0x454   : > { %s2511_s25 = smov %s2071_s26  ;;  %s2512_s26 = smov %s2156_s10 }
 0x455   : > { %s2513_s27 = smov %s2145_s30  ;;  %19 = sbr.rel (!%p17_p3) target bundleno = 3 (0x3), region = 83 }
 0x45c   :  { %1502 = vsyncpa [#allocation3], 1 }
 0x45d   :  { %1504 = vsyncpa [#allocation3 + $0x1], 1 }

</bundles_post_ra>
